<compile_context>
chip_gen: v6e
topology: v6e:2x2x1
jax: 0.10.0
libtpu: 0.0.40
codegen_flags: <defaults>
</compile_context>

<pallas_src>
import functools

import jax
import jax.numpy as jnp
from jax.experimental import pallas as pl
from jax.experimental.pallas import tpu as pltpu


def _layernorm_kernel(x_ref, alpha_ref, bias_ref, o_ref, *, epsilon):
    # x_ref block: (block_rows, d_model); alpha/bias block: (1, d_model)
    x = x_ref[...].astype(jnp.float32)
    d = x.shape[-1]

    # Hoisted, cast once per block (grid-invariant params, DMA'd once).
    alpha = alpha_ref[...].astype(jnp.float32)  # (1, d_model)
    bias = bias_ref[...].astype(jnp.float32)    # (1, d_model)

    # One-pass moments: two independent cross-lane (XLU) reductions.
    s1 = jnp.sum(x, axis=-1, keepdims=True)          # (rows, 1)
    s2 = jnp.sum(x * x, axis=-1, keepdims=True)      # (rows, 1)
    mean = s1 * (1.0 / d)
    # torch.std default is the unbiased estimator (divide by N-1).
    var_unbiased = jnp.maximum(s2 - d * mean * mean, 0.0) * (1.0 / (d - 1))
    std = jnp.sqrt(var_unbiased)

    # Per-row reciprocal (tiny column) instead of a full-tile divide.
    inv = pl.reciprocal(std + epsilon, approx=False)  # (rows, 1)

    centered = x - mean
    y = centered * inv * alpha + bias
    o_ref[...] = y.astype(o_ref.dtype)


def _round_up(n, m):
    return ((n + m - 1) // m) * m


def _pick_block_rows(rows, d_model, itemsize, *, tile_budget_bytes, min_grid_steps=8):
    # Sublane packing multiple for the I/O dtype (f32:8, bf16:16, int8/fp8:32).
    mult = max(8, 32 // max(itemsize, 1))

    # VMEM footprint per row ~= d_model * (in + out, double-buffered, in the
    # I/O dtype) + d_model * (f32 temporaries inside the kernel).
    bytes_per_row = d_model * (4 * itemsize + 8)
    budget_rows = max(mult, (tile_budget_bytes // bytes_per_row) // mult * mult)

    # Keep at least `min_grid_steps` grid steps so both v7x TensorCores (and
    # the software pipeline) stay busy on large inputs.
    target_rows = _round_up(max(1, pl.cdiv(rows, min_grid_steps)), mult)

    return max(mult, min(budget_rows, target_rows))


def layer_normalization(x, alpha, bias, *, epsilon=1e-6, block_rows=None):
    """x: (..., d_model); alpha, bias: (d_model,). Returns same shape/dtype as x."""
    orig_shape = x.shape
    d_model = orig_shape[-1]
    rows = 1
    for s in orig_shape[:-1]:
        rows *= s
    x2 = x.reshape(rows, d_model)

    itemsize = jnp.dtype(x.dtype).itemsize

    # Tile budget ~32 MiB and a 48 MiB scoped-VMEM request: above v5e's 16 MiB
    # default, within v6e's 128 MiB and v7x's 64 MiB physical VMEM.
    tile_budget_bytes = 32 * 1024 * 1024
    vmem_limit_bytes = 48 * 1024 * 1024

    if block_rows is None:
        block_rows = _pick_block_rows(
            rows, d_model, itemsize, tile_budget_bytes=tile_budget_bytes
        )

    # Ragged tail: pad rows up to a multiple of block_rows with zeros.
    # Padded rows yield mean=0, std=0 -> output = bias (finite); sliced away.
    padded_rows = _round_up(rows, block_rows)
    if padded_rows != rows:
        x2 = jnp.pad(x2, ((0, padded_rows - rows), (0, 0)))

    grid = (padded_rows // block_rows,)

    # Params presented as (1, d_model) so they live on the lane axis.
    alpha2 = alpha.reshape(1, d_model)
    bias2 = bias.reshape(1, d_model)

    kernel = functools.partial(_layernorm_kernel, epsilon=epsilon)

    out2 = pl.pallas_call(
        kernel,
        out_shape=jax.ShapeDtypeStruct((padded_rows, d_model), x.dtype),
        grid_spec=pltpu.PrefetchScalarGridSpec(
            num_scalar_prefetch=0,
            grid=grid,
            in_specs=[
                pl.BlockSpec((block_rows, d_model), lambda i: (i, 0)),
                pl.BlockSpec((1, d_model), lambda i: (0, 0)),
                pl.BlockSpec((1, d_model), lambda i: (0, 0)),
            ],
            out_specs=pl.BlockSpec((block_rows, d_model), lambda i: (i, 0)),
        ),
        compiler_params=pltpu.CompilerParams(
            dimension_semantics=("parallel",),
            vmem_limit_bytes=vmem_limit_bytes,
        ),
    )(x2, alpha2, bias2)

    if padded_rows != rows:
        out2 = out2[:rows]
    return out2.reshape(orig_shape)


if __name__ == "__main__":
    # Small shapes implied by the module: (batch, seq, d_model)
    batch, seq, d_model = 2, 8, 32
    epsilon = 1e-6

    key = jax.random.PRNGKey(0)
    x = jax.random.normal(key, (batch, seq, d_model), dtype=jnp.float32)

    # Deterministic parameter init matching nn.Parameter(torch.ones/zeros(d_model))
    alpha = jnp.ones((d_model,), dtype=jnp.float32)
    bias = jnp.zeros((d_model,), dtype=jnp.float32)

    out = layer_normalization(x, alpha, bias, epsilon=epsilon)
    out = jax.block_until_ready(out)

    # Pure-JAX reference (unbiased std, eps added to std) for sanity checking.
    mean = jnp.mean(x, axis=-1, keepdims=True)
    var_unb = jnp.sum((x - mean) ** 2, axis=-1, keepdims=True) / (d_model - 1)
    ref = alpha * (x - mean) / (jnp.sqrt(var_unb) + epsilon) + bias
    assert jnp.allclose(out, ref, atol=1e-5, rtol=1e-5), "mismatch vs reference"

    print("KERNEL_OK")
</pallas_src>

<mosaic_0001>
module attributes {stable_mosaic.version = 11 : i64} {
  func.func @_layernorm_kernel(%arg0: i32, %arg1: memref<8x32xf32, #tpu.memory_space<vmem>>, %arg2: memref<1x32xf32, #tpu.memory_space<vmem>>, %arg3: memref<1x32xf32, #tpu.memory_space<vmem>>, %arg4: memref<8x32xf32, #tpu.memory_space<vmem>>) attributes {dimension_semantics = [#tpu.dimension_semantics<parallel>], iteration_bounds = array<i64: 2>, scalar_prefetch = 0 : i64, scratch_operands = 0 : i64, tpu.core_type = #tpu.core_type<tc>, window_params = [{transform_indices = @transform_0, window_bounds = array<i64: 8, 32>}, {pipeline_mode = #tpu.pipeline_mode<synchronous>, transform_indices = @transform_1, window_bounds = array<i64: 1, 32>}, {pipeline_mode = #tpu.pipeline_mode<synchronous>, transform_indices = @transform_2, window_bounds = array<i64: 1, 32>}, {transform_indices = @transform_3, window_bounds = array<i64: 8, 32>}]} {
    %c0 = arith.constant 0 : index
    %c0_0 = arith.constant 0 : index
    %0 = vector.load %arg1[%c0, %c0_0] : memref<8x32xf32, #tpu.memory_space<vmem>>, vector<8x32xf32>
    %c0_1 = arith.constant 0 : index
    %c0_2 = arith.constant 0 : index
    %1 = vector.load %arg2[%c0_1, %c0_2] : memref<1x32xf32, #tpu.memory_space<vmem>>, vector<1x32xf32>
    %c0_3 = arith.constant 0 : index
    %c0_4 = arith.constant 0 : index
    %2 = vector.load %arg3[%c0_3, %c0_4] : memref<1x32xf32, #tpu.memory_space<vmem>>, vector<1x32xf32>
    %cst = arith.constant dense<0.000000e+00> : vector<8xf32>
    %3 = vector.multi_reduction <add>, %0, %cst [1] : vector<8x32xf32> to vector<8xf32>
    %4 = vector.shape_cast %3 : vector<8xf32> to vector<8x1xf32>
    %5 = arith.mulf %0, %0 : vector<8x32xf32>
    %cst_5 = arith.constant dense<0.000000e+00> : vector<8xf32>
    %6 = vector.multi_reduction <add>, %5, %cst_5 [1] : vector<8x32xf32> to vector<8xf32>
    %7 = vector.shape_cast %6 : vector<8xf32> to vector<8x1xf32>
    %cst_6 = arith.constant 3.125000e-02 : f32
    %8 = vector.broadcast %cst_6 : f32 to vector<8x1xf32>
    %9 = arith.mulf %4, %8 : vector<8x1xf32>
    %cst_7 = arith.constant 3.200000e+01 : f32
    %10 = vector.broadcast %cst_7 : f32 to vector<8x1xf32>
    %11 = arith.mulf %10, %9 : vector<8x1xf32>
    %12 = arith.mulf %11, %9 : vector<8x1xf32>
    %13 = arith.subf %7, %12 : vector<8x1xf32>
    %cst_8 = arith.constant 0.000000e+00 : f32
    %14 = vector.broadcast %cst_8 : f32 to vector<8x1xf32>
    %15 = arith.maximumf %13, %14 : vector<8x1xf32>
    %cst_9 = arith.constant 0.0322580636 : f32
    %16 = vector.broadcast %cst_9 : f32 to vector<8x1xf32>
    %17 = arith.mulf %15, %16 : vector<8x1xf32>
    %18 = math.sqrt %17 : vector<8x1xf32>
    %cst_10 = arith.constant 9.99999997E-7 : f32
    %19 = vector.broadcast %cst_10 : f32 to vector<8x1xf32>
    %20 = arith.addf %18, %19 : vector<8x1xf32>
    %21 = tpu.reciprocal %20 : vector<8x1xf32> -> vector<8x1xf32>
    %22 = vector.broadcast %9 : vector<8x1xf32> to vector<8x32xf32>
    %23 = arith.subf %0, %22 : vector<8x32xf32>
    %24 = vector.broadcast %21 : vector<8x1xf32> to vector<8x32xf32>
    %25 = arith.mulf %23, %24 : vector<8x32xf32>
    %26 = vector.broadcast %1 : vector<1x32xf32> to vector<8x32xf32>
    %27 = arith.mulf %25, %26 : vector<8x32xf32>
    %28 = vector.broadcast %2 : vector<1x32xf32> to vector<8x32xf32>
    %29 = arith.addf %27, %28 : vector<8x32xf32>
    %c0_11 = arith.constant 0 : index
    %c0_12 = arith.constant 0 : index
    %30 = vector.load %arg4[%c0_11, %c0_12] : memref<8x32xf32, #tpu.memory_space<vmem>>, vector<8x32xf32>
    tpu.vector_store %arg4[%c0_11, %c0_12], %29 {strides = array<i32>} : memref<8x32xf32, #tpu.memory_space<vmem>>, vector<8x32xf32>,
    return
  }
  func.func @transform_0(%arg0: i32) -> (i32, i32) {
    %c0_i32 = arith.constant 0 : i32
    %c0_i32_0 = arith.constant 0 : i32
    return %arg0, %c0_i32 : i32, i32
  }
  func.func @transform_1(%arg0: i32) -> (i32, i32) {
    %c0_i32 = arith.constant 0 : i32
    %c0_i32_0 = arith.constant 0 : i32
    %c0_i32_1 = arith.constant 0 : i32
    return %c0_i32, %c0_i32_0 : i32, i32
  }
  func.func @transform_2(%arg0: i32) -> (i32, i32) {
    %c0_i32 = arith.constant 0 : i32
    %c0_i32_0 = arith.constant 0 : i32
    %c0_i32_1 = arith.constant 0 : i32
    return %c0_i32, %c0_i32_0 : i32, i32
  }
  func.func @transform_3(%arg0: i32) -> (i32, i32) {
    %c0_i32 = arith.constant 0 : i32
    %c0_i32_0 = arith.constant 0 : i32
    return %arg0, %c0_i32 : i32, i32
  }
}

</mosaic_0001>

<bundles_post_ra>
// kernel: tpu_custom_call.1
= control target key start
LH: loop header
LB: loop body
LE: loop exit
PB: predicated region body
PF: predicated region fallthrough
CT: control target
= control target key end

     0   :  { %8 = vsyncpa [#allocation3], 0  ;;  %s647_s0 = inlined_call_operand.hbm [shape: f32[16,32], index: 0, kind: input, shape index: {}]   ;;  %s648_s1 = inlined_call_operand.vmem [shape: f32[1,32], index: 1, kind: input, shape index: {}]   ;;  %s649_s2 = inlined_call_operand.vmem [shape: f32[1,32], index: 2, kind: input, shape index: {}]   ;;  %s650_s3 = inlined_call_operand.hbm [shape: f32[16,32], index: 3, kind: output, shape index: {}]  }
   0x1   :  { %10 = vsyncpa [#allocation3 + $0x1], 0 }
   0x2   :  { %11 = vsyncpa [#allocation4], 0 }
   0x3   :  { %13 = vsyncpa [#allocation4 + $0x1], 0  ;;  %s493_s12 = smov 0   ;;  %s495_s13 = smov 0  }
   0x4   :  { %s497_s14 = smov 0   ;;  %s499_s15 = smov 0  }
   0x5 LB: > { %s514_s16 = sadd.s32 4294967295, %s469_s15   ;;  %s313_s17 = sadd.s32 4294967294, %s469_s15   ;;  %s469_s15 = sphi %s499_s15, %s667_s15   ;;  %s465_s14 = sphi %s497_s14, %s666_s14   ;;  %s461_s13 = sphi %s495_s13, %s665_s13   ;;  %s457_s12 = sphi %s493_s12, %s664_s12  }
   0x6   : > { %s518_s18 = sadd.s32 1, %s469_s15   ;;  %s26_s19 = sadd.s32 1, %s465_s14 }
   0x7   : > { %s23_s20 = ssub.s32 %s469_s15, %s518_s18  ;;  %p33_p0 = scmp.ne.s32.totalorder %s465_s14, %s461_s13 }
   0x8   : > { %p24_p1 = scmp.eq.s32.totalorder %s23_s20, 0  ;;  %p34_p2 = scmp.eq.s32.totalorder %s469_s15, 0 }
   0x9   : > { %p39_p3 = scmp.ne.s32.totalorder %s461_s13, %s457_s12  ;;  %p40_p4 = scmp.eq.s32.totalorder %s514_s16, 0 }
   0xa   : > { %s530_s21 = scalar_select %p24_p1, %s465_s14, %s26_s19  }
   0xb   : > { %p532_p5 = por %p34_p2, %p33_p0  ;;  %p536_p6 = por %p40_p4, %p39_p3 }
   0xc   : > { %p105_p7 = scmp.eq.s32.totalorder %s514_s16, 1  ;;  %p111_p8 = scmp.eq.s32.totalorder %s313_s17, 1 }
   0xd   : > { %s654_s23 = scalar_select %p536_p6, 1, 0 }
   0xe   : > { %p339_p10 = scmp.lt.s32.totalorder %s469_s15, 2  ;;  %p543_p11 = por %p105_p7, %p33_p0 }
   0xf   : > { %p547_p12 = por %p111_p8, %p39_p3  ;;  %s137_s26 = sand.u32 1, %s465_s14  }
  0x10   : > { %s655_s24 = scalar_select %p543_p11, 1, 0 }
  0x11   : > { %s656_s25 = scalar_select %p547_p12, 1, 0 }
  0x12   : > { %s317_s27 = sshll.u32 %s469_s15, 7  ;;  %s316_s28 = sshll.u32 %s137_s26, 3 }
  0x13   : > { %s556_s4 = scalar_lea.hbm %s647_s0, %s317_s27  ;;  %s141_s5 = scalar_lea.vmem [#allocation2], %s316_s28 }
  0x14   : > { %s148_s6 = sshll.u32 %s141_s5, 4  ;;  %p560_p13 = pnand %p339_p10, %p532_p5  ;;  %s564_s6 = int_to_ptr.vmem [resolvable:$true] %s148_s6 }
  0x15   : > { %s138_s8 = scalar_lea.sflag [#allocation3], %s137_s26  ;;  %s377_s9 = scalar_lea.hbm %s556_s4, 128 }
  0x16   : > { %p378_p2 = scmp.ne.s32.totalorder %s556_s4, %s377_s9  ;;  %p379_p3 = pneg %p560_p13 }
  0x17   : > { %s382_s17 = scalar_lea.hbm %s647_s0, 256  ;;  %p383_p5 = scmp.lt.s32.totalorder %s556_s4, %s647_s0 }
  0x18   : > { %p380_p4 = pnand %p379_p3, %p378_p2  ;;  %p384_p8 = scmp.lt.s32.totalorder %s382_s17, %s377_s9 }
  0x1a   : > { %p381_p7 = pneg %p380_p4  ;;  %p385_p10 = por %p384_p8, %p383_p5 }
  0x1c   : > { %p386_p9 = pnand %p385_p10, %p381_p7 }
  0x1e   : > { %389 = shalt.err (!%p386_p9)
}
  0x1f   : > { %s390_s22 = scalar_lea.vmem %s564_s6, 128  ;;  %s471_s26 = smov [#allocation2]  }
  0x20   : > { %p391_p0 = scmp.ne.s32.totalorder %s564_s6, %s390_s22  ;;  %s395_s27 = sshll.u32 %s471_s26, 4  ;;  %s396_s27 = int_to_ptr.vmem [resolvable:$false] %s395_s27 }
  0x21   : > { %s397_s28 = scalar_lea.vmem %s396_s27, 256  ;;  %p398_p4 = scmp.lt.s32.totalorder %s564_s6, %s396_s27 }
  0x22   : > { %p393_p1 = pnand %p391_p0, %p379_p3  ;;  %p399_p12 = scmp.lt.s32.totalorder %s397_s28, %s390_s22 }
  0x24   : > { %p394_p2 = pneg %p393_p1  ;;  %p400_p11 = por %p399_p12, %p398_p4 }
  0x26   : > { %p401_p6 = pnand %p400_p11, %p394_p2 }
  0x28   : > { %404 = shalt.err (!%p401_p6)
}
  0x29   : > { %334 = dma.hbm_to_vmem [thread:$0]  (!%p560_p13), %s556_s4, 128, %s564_s6, %s138_s8  }
  0x2a   : > { %p658_p9 = scmp.lt.s32.totalorder %s469_s15, 3  ;;  %p659_p7 = scmp.ge.s32.totalorder %s469_s15, 1 }
  0x2c   : > { %p154_p0 = pnand %p659_p7, %p658_p9 }
  0x2d   : > { %s591_s29 = sand.u32 (!%p154_p0), 1, %s461_s13   ;;  %p660_p6 = scmp.ne.s32.totalorder (!%p154_p0), %s654_s23, 0 }
  0x2e   : > { %157 = sbr.rel (%p154_p0) target bundleno = 257 (0x101), region = 32  ;;  %s319_s30 = sshll.u32 (!%p154_p0), %s591_s29, 3 }
  0x2f   : > { %s160_s5 = scalar_lea.sflag (!%p154_p0), [#allocation3], %s591_s29  ;;  %s163_s7 = scalar_lea.vmem (!%p154_p0), [#allocation2], %s319_s30 }
  0x33   : > { %448 = dma.done.wait (%p660_p6), %s160_s5, 128  }
  0x34   : > { %450 = vsyncadd (%p660_p6), %s160_s5, 4294967168  ;;  %vm189_vm0 = vcmask 261120   ;;  %v186_v0 = vld [vmem:[%s163_s7] sm:$0xff]  ;;  %s324_s9 = sshll.u32 %s514_s16, 7  ;;  %s185_s10 = scalar_lea.vmem [#allocation5], %s319_s30 }
  0x35   : > { %v190_v1 = vsel %vm189_vm0, %v186_v0, 0.0  ;;  %v193_v2 = vmul.f32 %v186_v0, %v186_v0  ;;  %v321_v20 = vld [vmem:[%s648_s1] ss:$0 sm:$0xff]  ;;  %s243_s11 = sshll.u32 %s185_s10, 4  ;;  %s241_s20 = scalar_lea.hbm %s650_s3, %s324_s9  ;;  %s244_s11 = int_to_ptr.vmem [resolvable:$true] %s243_s11 }
  0x36   : > { %191 = vadd.xlane.f32.xlu0 %v190_v1  ;;  %v322_v22 = vld [vmem:[%s649_s2] ss:$0 sm:$0xff]  ;;  %s230_s22 = scalar_lea.sflag [#allocation4], %s591_s29  ;;  %s405_s26 = scalar_lea.vmem %s244_s11, 128 }
  0x37   : > { %v194_v3 = vsel %vm189_vm0, %v193_v2, 0.0  ;;  %p406_p11 = scmp.ne.s32.totalorder %s244_s11, %s405_s26  ;;  %p661_p12 = scmp.ne.s32.totalorder %s655_s24, 0 }
  0x38   : > { %s472_s27 = smov [#allocation5]  }
  0x39   : > { %p407_p13 = pnand %p406_p11, %p661_p12  ;;  %s409_s16 = sshll.u32 %s472_s27, 4  ;;  %s410_s16 = int_to_ptr.vmem [resolvable:$false] %s409_s16 }
  0x3a   : > { %195 = vadd.xlane.f32.xlu0 %v194_v3  ;;  %s411_s28 = scalar_lea.vmem %s410_s16, 256  ;;  %p412_p3 = scmp.lt.s32.totalorder %s244_s11, %s410_s16 }
  0x3b   : > { %p408_p1 = pneg %p407_p13  ;;  %p413_p5 = scmp.lt.s32.totalorder %s411_s28, %s405_s26 }
  0x3d   : > { %p414_p8 = por %p413_p5, %p412_p3 }
  0x3f   : > { %p415_p10 = pnand %p414_p8, %p408_p1 }
  0xbf   : > { %v192_v4 = vpop.xlane.xlu0 %191 }
  0xc0   : > { %v197_v5 = vmul.f32 0.03125, %v192_v4 }
  0xc2   : > { %v198_v6 = vmul.f32 32.0, %v197_v5  ;;  %v212_v18 = vsub.f32 %v186_v0, %v197_v5 }
  0xc3   : > { %v196_v7 = vpop.xlane.xlu0 %195 }
  0xc4   : > { %v199_v8 = vmul.f32 %v198_v6, %v197_v5 }
  0xc6   : > { %v200_v9 = vsub.f32 %v196_v7, %v199_v8 }
  0xc8   : > { %v201_v10 = vmax.f32 %v200_v9, 0.0 }
  0xca   : > { %v202_v11 = vmul.f32 0.032258064, %v201_v10 }
  0xcc   : > { %373 = vrsqrt.f32 %v202_v11  ;;  %vm205_vm1 = vcmp.eq.f32.partialorder %v202_v11, inf  ;;  %v208_v14 = vand.u32 2147483648, %v202_v11  ;;  %vm207_vm2 = vcmp.eq.f32.partialorder %v202_v11, 0.0 }
  0xd9   : > { %v374_v12 = vpop.eup %373 }
  0xda   : > { %v204_v13 = vmul.f32 %v374_v12, %v202_v11 }
  0xdc   : > { %v206_v15 = vsel %vm205_vm1, %v202_v11, %v204_v13 }
  0xdd   : > { %v209_v16 = vsel %vm207_vm2, %v208_v14, %v206_v15 }
  0xde   : > { %v210_v17 = vadd.f32 1e-06, %v209_v16 }
  0xe0   : > { %375 = vrcp.f32 %v210_v17 }
  0xed   : > { %v376_v19 = vpop.eup %375 }
  0xee   : > { %v213_v21 = vmul.f32 %v376_v19, %v212_v18 }
  0xf0   : > { %v220_v23 = vmul.f32 %v321_v20, %v213_v21 }
  0xf2   : > { %v227_v24 = vadd.f32 %v322_v22, %v220_v23 }
  0xf4   : > { %228 = vst.msk [vmem:[%s185_s10] sm:$0xff] %vm189_vm0, %v227_v24 }
  0xf5   : > { %418 = shalt.err (!%p415_p10)
}
  0xf6   : > { %s419_s30 = scalar_lea.hbm %s241_s20, 128  ;;  %s423_s7 = scalar_lea.hbm %s650_s3, 256 }
  0xf7   : > { %p420_p2 = scmp.ne.s32.totalorder %s241_s20, %s419_s30  ;;  %p424_p7 = scmp.lt.s32.totalorder %s241_s20, %s650_s3 }
  0xf8   : > { %p425_p0 = scmp.lt.s32.totalorder %s423_s7, %s419_s30 }
  0xf9   : > { %p421_p4 = pnand %p420_p2, %p661_p12 }
  0xfa   : > { %p426_p6 = por %p425_p0, %p424_p7 }
  0xfb   : > { %p422_p9 = pneg %p421_p4 }
  0xfd   : > { %p427_p11 = pnand %p426_p6, %p422_p9 }
  0xff   : > { %430 = shalt.err (!%p427_p11)
}
 0x100   : > { %329 = dma.vmem_to_hbm [thread:$0]  (%p661_p12), %s244_s11, 128, %s241_s20, %s230_s22  }
 0x101 PF: > { %s255_s6 = sand.u32 1, %s457_s12   ;;  %p662_p13 = scmp.ne.s32.totalorder %s656_s25, 0 }
 0x102   : > { %p663_p1 = scmp.ge.s32.totalorder %s469_s15, 2  ;;  %s256_s8 = scalar_lea.sflag [#allocation4], %s255_s6 }
 0x104   : > { %p336_p3 = pnand %p663_p1, %p662_p13 }
 0x106   : > { %p337_p5 = pneg %p336_p3 }
 0x108   : > { %452 = dma.done.wait (%p337_p5), %s256_s8, 128  }
 0x109   : > { %454 = vsyncadd (%p337_p5), %s256_s8, 4294967168  ;;  %p16_p8 = scmp.ge.s32.totalorder %s518_s18, 4   ;;  %s664_s12 = smov %s461_s13 }
 0x10a   : > { %s665_s13 = smov %s465_s14  ;;  %s666_s14 = smov %s530_s21 }
 0x10b   : > { %s667_s15 = smov %s518_s18  ;;  %18 = sbr.rel (!%p16_p8) target bundleno = 5 (0x5), region = 77 }
 0x110   :  { %261 = vsyncpa [#allocation3], 1 }
 0x111   :  { %263 = vsyncpa [#allocation3 + $0x1], 1 }
 0x112   :  { %264 = vsyncpa [#allocation4], 1 }
 0x113   :  { %266 = vsyncpa [#allocation4 + $0x1], 1 }

</bundles_post_ra>
